<compile_context>
chip_gen: v5e
topology: v5e:2x2
jax: 0.10.0
libtpu: 0.0.40
codegen_flags: <defaults>
</compile_context>

<pallas_src>
import functools

import jax
import jax.numpy as jnp
from jax import lax
from jax.experimental import pallas as pl
from jax.experimental.pallas import tpu as pltpu

_LANES = 128
_DEFAULT_TILE_ELEMS = 1 << 19   # ~2 MiB of f32 per full-tile temporary


def _make_kernel(n_rows, n_cols, tile_rows, acc_rows, inner_steps):
    def kernel(x_ref, t_ref, o_ref, acc_ref):
        s = pl.program_id(0)                      # shard (megacore-parallel axis)
        i = pl.program_id(1)                      # row block within the shard

        @pl.when(i == 0)
        def _init():
            acc_ref[...] = jnp.zeros_like(acc_ref)

        x = x_ref[...].astype(jnp.float32)        # (TILE_N, C) logits tile
        t = t_ref[...]                            # (TILE_N, 1) int32 targets

        # Logical first row of this grid step.  Rows >= n_rows (ragged last
        # block, or the clamped overshoot step of an odd shard split) are
        # masked so they contribute exactly zero.
        row0 = (s * inner_steps + i) * tile_rows
        row = row0 + lax.broadcasted_iota(jnp.int32, (tile_rows, 1), 0)
        valid = row < n_rows                      # (TILE_N, 1)

        # Fused F.one_hot: lane iota compared against the per-row target id.
        col = lax.broadcasted_iota(jnp.int32, (tile_rows, n_cols), 1)
        onehot = (col == t).astype(jnp.float32)   # (TILE_N, C)
        diff = x - onehot
        sq = jnp.where(valid, diff * diff, 0.0)

        # Fold into `acc_rows` independent partial-sum rows (pure VALU adds,
        # short dependency chains); no cross-lane work until finalize.
        acc_ref[...] += sq.reshape(-1, acc_rows, n_cols).sum(axis=0)

        @pl.when(i == inner_steps - 1)
        def _finalize():
            o_ref[...] = jnp.sum(acc_ref[...]).reshape(1, 1, 1)

    return kernel


@functools.partial(jax.jit, static_argnames=("max_tile_elems",))
def mse_loss_classification(logits, target, *, max_tile_elems=_DEFAULT_TILE_ELEMS):
    """logits: (N, C) float; target: (N,) int class ids in [0, C) -> f32 loss.

    Note: like jax.nn.one_hot (and unlike torch F.one_hot, which raises),
    out-of-range / negative targets silently yield an all-zero one-hot row.
    """
    n, c = logits.shape
    itemsize = jnp.dtype(logits.dtype).itemsize

    c_pad = pl.cdiv(c, _LANES) * _LANES            # lane-padded row width
    pack = max(8, 32 // itemsize)                  # sublane packing: f32 8 / bf16 16 / i8 32

    # Row-tile size: ~max_tile_elems elements per tile, rounded to the sublane
    # packing; a single full-rows block when N already fits.
    tile = max(pack, (max_tile_elems // c_pad) // pack * pack)
    if n <= tile:
        tile = n
    acc_rows = next((r for r in (64, 32, 16, 8) if tile % r == 0), tile)

    nblocks = pl.cdiv(n, tile)
    num_shards = 2 if nblocks >= 2 else 1          # v7x: one row shard per TensorCore
    inner = pl.cdiv(nblocks, num_shards)
    last_blk = nblocks - 1

    # Clamp the (rare) overshoot step of an odd shard split onto the last real
    # block so no fully out-of-bounds DMA is ever issued; the kernel's row
    # mask zeroes that step's contribution.
    def row_block_map(s, i):
        return (jnp.minimum(s * inner + i, last_blk), 0)

    t2d = target.astype(jnp.int32).reshape(n, 1)

    kernel = _make_kernel(n, c, tile, acc_rows, inner)

    partials = pl.pallas_call(
        kernel,
        out_shape=jax.ShapeDtypeStruct((num_shards, 1, 1), jnp.float32),
        grid=(num_shards, inner),
        in_specs=[
            pl.BlockSpec((tile, c), row_block_map),   # logits, dtype-native stream
            pl.BlockSpec((tile, 1), row_block_map),   # int32 targets column
        ],
        out_specs=pl.BlockSpec((1, 1, 1), lambda s, i: (s, 0, 0)),
        scratch_shapes=[pltpu.VMEM((acc_rows, c), jnp.float32)],
        compiler_params=pltpu.CompilerParams(
            dimension_semantics=("parallel", "arbitrary"),
            vmem_limit_bytes=40 * 1024 * 1024),
        cost_estimate=pl.CostEstimate(
            flops=5 * n * c,
            transcendentals=0,
            bytes_accessed=n * c_pad * itemsize + n * _LANES * 4 + num_shards * 4),
    )(logits, t2d)

    return jnp.sum(partials) / jnp.float32(n * c)


if __name__ == "__main__":
    key = jax.random.PRNGKey(0)
    k1, k2, k3, k4 = jax.random.split(key, 4)

    def ref_loss(x, t):
        onehot = jax.nn.one_hot(t, x.shape[1], dtype=jnp.float32)
        return jnp.mean((x.astype(jnp.float32) - onehot) ** 2)

    # Small shape consistent with the module: batch of 8 logits over 32 classes.
    N, C = 8, 32
    logits = jax.random.normal(k1, (N, C), dtype=jnp.float32)
    target = jax.random.randint(k2, (N,), 0, C, dtype=jnp.int32)
    loss = mse_loss_classification(logits, target)
    jax.block_until_ready(loss)
    ref = ref_loss(logits, target)
    assert jnp.allclose(loss, ref, rtol=1e-5, atol=1e-6), (loss, ref)

    # Ragged multi-block / two-shard path (forced small tiles): 40 rows over 3
    # row blocks of 16 exercises the partial last block, the clamped overshoot
    # step and the per-shard partial sums.
    N2, C2 = 40, 32
    logits2 = jax.random.normal(k3, (N2, C2), dtype=jnp.float32)
    target2 = jax.random.randint(k4, (N2,), 0, C2, dtype=jnp.int32)
    loss2 = mse_loss_classification(logits2, target2, max_tile_elems=16 * 128)
    jax.block_until_ready(loss2)
    ref2 = ref_loss(logits2, target2)
    assert jnp.allclose(loss2, ref2, rtol=1e-5, atol=1e-6), (loss2, ref2)

    print("KERNEL_OK")
</pallas_src>

<mosaic_0001>
module attributes {stable_mosaic.version = 11 : i64} {
  func.func @kernel(%arg0: i32, %arg1: i32, %arg2: memref<8x32xf32, #tpu.memory_space<vmem>>, %arg3: memref<8x1xi32, #tpu.memory_space<vmem>>, %arg4: memref<1x1x1xf32, #tpu.memory_space<vmem>>, %arg5: memref<8x32xf32, #tpu.memory_space<vmem>>) attributes {dimension_semantics = [#tpu.dimension_semantics<parallel>, #tpu.dimension_semantics<arbitrary>], iteration_bounds = array<i64: 1, 1>, scalar_prefetch = 0 : i64, scratch_operands = 1 : i64, tpu.core_type = #tpu.core_type<tc>, window_params = [{transform_indices = @transform_0, window_bounds = array<i64: 8, 32>}, {transform_indices = @transform_1, window_bounds = array<i64: 8, 1>}, {transform_indices = @transform_2, window_bounds = array<i64: 1, 1, 1>}]} {
    %c0_i32 = arith.constant 0 : i32
    %0 = arith.cmpi eq, %arg1, %c0_i32 : i32
    %1 = arith.extui %0 : i1 to i32
    %c0_i32_0 = arith.constant 0 : i32
    %2 = arith.cmpi ne, %1, %c0_i32_0 : i32
    scf.if %2 {
      %cst_12 = arith.constant 0.000000e+00 : f32
      %32 = vector.broadcast %cst_12 : f32 to vector<8x32xf32>
      %c0_13 = arith.constant 0 : index
      %c0_14 = arith.constant 0 : index
      %33 = vector.load %arg5[%c0_13, %c0_14] : memref<8x32xf32, #tpu.memory_space<vmem>>, vector<8x32xf32>
      tpu.vector_store %arg5[%c0_13, %c0_14], %32 {strides = array<i32>} : memref<8x32xf32, #tpu.memory_space<vmem>>, vector<8x32xf32>,
    } else {
    }
    %c0 = arith.constant 0 : index
    %c0_1 = arith.constant 0 : index
    %3 = vector.load %arg2[%c0, %c0_1] : memref<8x32xf32, #tpu.memory_space<vmem>>, vector<8x32xf32>
    %c0_2 = arith.constant 0 : index
    %c0_3 = arith.constant 0 : index
    %4 = vector.load %arg3[%c0_2, %c0_3] : memref<8x1xi32, #tpu.memory_space<vmem>>, vector<8x1xi32>
    %c1_i32 = arith.constant 1 : i32
    %5 = arith.muli %arg0, %c1_i32 : i32
    %6 = arith.addi %5, %arg1 : i32
    %c8_i32 = arith.constant 8 : i32
    %7 = arith.muli %6, %c8_i32 : i32
    %8 = tpu.iota {dimensions = array<i32: 0>} : vector<8x1xi32>
    %9 = vector.broadcast %7 : i32 to vector<8x1xi32>
    %10 = arith.addi %9, %8 : vector<8x1xi32>
    %c8_i32_4 = arith.constant 8 : i32
    %11 = vector.broadcast %c8_i32_4 : i32 to vector<8x1xi32>
    %12 = arith.cmpi slt, %10, %11 : vector<8x1xi32>
    %13 = tpu.iota {dimensions = array<i32: 1>} : vector<8x32xi32>
    %14 = vector.broadcast %4 : vector<8x1xi32> to vector<8x32xi32>
    %15 = arith.cmpi eq, %13, %14 : vector<8x32xi32>
    %16 = arith.extui %15 : vector<8x32xi1> to vector<8x32xi32>
    %17 = arith.sitofp %16 : vector<8x32xi32> to vector<8x32xf32>
    %18 = arith.subf %3, %17 : vector<8x32xf32>
    %19 = arith.mulf %18, %18 : vector<8x32xf32>
    %cst = arith.constant 0.000000e+00 : f32
    %20 = vector.shape_cast %12 : vector<8x1xi1> to vector<8x1xi1>
    %21 = vector.broadcast %20 : vector<8x1xi1> to vector<8x32xi1>
    %22 = vector.broadcast %cst : f32 to vector<8x32xf32>
    %23 = arith.select %21, %19, %22 : vector<8x32xi1>, vector<8x32xf32>
    %c0_5 = arith.constant 0 : index
    %c0_6 = arith.constant 0 : index
    %24 = vector.load %arg5[%c0_5, %c0_6] : memref<8x32xf32, #tpu.memory_space<vmem>>, vector<8x32xf32>
    %25 = vector.shape_cast %23 : vector<8x32xf32> to vector<1x8x32xf32>
    %cst_7 = arith.constant dense<0.000000e+00> : vector<8x32xf32>
    %26 = vector.multi_reduction <add>, %25, %cst_7 [0] : vector<1x8x32xf32> to vector<8x32xf32>
    %27 = arith.addf %24, %26 : vector<8x32xf32>
    %c0_8 = arith.constant 0 : index
    %c0_9 = arith.constant 0 : index
    %28 = vector.load %arg5[%c0_8, %c0_9] : memref<8x32xf32, #tpu.memory_space<vmem>>, vector<8x32xf32>
    tpu.vector_store %arg5[%c0_8, %c0_9], %27 {strides = array<i32>} : memref<8x32xf32, #tpu.memory_space<vmem>>, vector<8x32xf32>,
    %c0_i32_10 = arith.constant 0 : i32
    %29 = arith.cmpi eq, %arg1, %c0_i32_10 : i32
    %30 = arith.extui %29 : i1 to i32
    %c0_i32_11 = arith.constant 0 : i32
    %31 = arith.cmpi ne, %30, %c0_i32_11 : i32
    scf.if %31 {
      %c0_12 = arith.constant 0 : index
      %c0_13 = arith.constant 0 : index
      %32 = vector.load %arg5[%c0_12, %c0_13] : memref<8x32xf32, #tpu.memory_space<vmem>>, vector<8x32xf32>
      %33 = vector.shape_cast %32 : vector<8x32xf32> to vector<1x8x32xf32>
      %cst_14 = arith.constant dense<0.000000e+00> : vector<1xf32>
      %34 = vector.multi_reduction <add>, %33, %cst_14 [1, 2] : vector<1x8x32xf32> to vector<1xf32>
      %35 = vector.shape_cast %34 : vector<1xf32> to vector<1x1x1xf32>
      %36 = vector.extract %35[0, 0, 0] : f32 from vector<1x1x1xf32>
      %37 = vector.broadcast %36 : f32 to vector<1x1x1xf32>
      %c0_15 = arith.constant 0 : index
      %c0_16 = arith.constant 0 : index
      %c0_17 = arith.constant 0 : index
      %38 = vector.load %arg4[%c0_15, %c0_16, %c0_17] : memref<1x1x1xf32, #tpu.memory_space<vmem>>, vector<1x1x1xf32>
      tpu.vector_store %arg4[%c0_15, %c0_16, %c0_17], %37 {strides = array<i32>} : memref<1x1x1xf32, #tpu.memory_space<vmem>>, vector<1x1x1xf32>,
    } else {
    }
    return
  }
  func.func @transform_0(%arg0: i32, %arg1: i32) -> (i32, i32) {
    %c1_i32 = arith.constant 1 : i32
    %0 = arith.muli %arg0, %c1_i32 : i32
    %1 = arith.addi %0, %arg1 : i32
    %c0_i32 = arith.constant 0 : i32
    %2 = arith.minsi %1, %c0_i32 : i32
    %c0_i32_0 = arith.constant 0 : i32
    %c0_i32_1 = arith.constant 0 : i32
    return %2, %c0_i32_0 : i32, i32
  }
  func.func @transform_1(%arg0: i32, %arg1: i32) -> (i32, i32) {
    %c1_i32 = arith.constant 1 : i32
    %0 = arith.muli %arg0, %c1_i32 : i32
    %1 = arith.addi %0, %arg1 : i32
    %c0_i32 = arith.constant 0 : i32
    %2 = arith.minsi %1, %c0_i32 : i32
    %c0_i32_0 = arith.constant 0 : i32
    %c0_i32_1 = arith.constant 0 : i32
    return %2, %c0_i32_0 : i32, i32
  }
  func.func @transform_2(%arg0: i32, %arg1: i32) -> (i32, i32, i32) {
    %c0_i32 = arith.constant 0 : i32
    %c0_i32_0 = arith.constant 0 : i32
    %c0_i32_1 = arith.constant 0 : i32
    return %arg0, %c0_i32, %c0_i32_0 : i32, i32, i32
  }
}

</mosaic_0001>

<bundles_post_ra>
// kernel: mse_loss_classification.1
= control target key start
LH: loop header
LB: loop body
LE: loop exit
PB: predicated region body
PF: predicated region fallthrough
CT: control target
= control target key end

     0   :  { %s204_s0 = inlined_call_operand.vmem [shape: f32[8,32], index: 0, kind: input, shape index: {}]   ;;  %s205_s1 = inlined_call_operand.vmem [shape: s32[8,1], index: 1, kind: input, shape index: {}]   ;;  %s206_s2 = inlined_call_operand.hbm [shape: f32[1,1,1], index: 2, kind: output, shape index: {}]  }
   0x1   :  { %v73_v0 = vld [vmem:[%s205_s1] sm:$0xff] }
   0x2   :  { %7 = vsyncpa [#allocation4], 0  ;;  %v177_v1 = vmov 0   ;;  %vm70_vm0 = vcmask 261120   ;;  %v178_v2 = vmov 0.0   ;;  %v81_v3 = vlaneseq  ;;  %v72_v6 = vld [vmem:[%s204_s0] sm:$0xff] }
   0x3   :  { %150 = vset.pattern.permute.xlu0 %v177_v1  ;;  %71 = vst.msk [vmem:[#allocation2] sm:$0xff] %vm70_vm0, %v178_v2  ;;  %s179_s1 = smov [#allocation3]   ;;  %s123_s15 = sshll.u32 %s206_s2, 4  ;;  %vm114_vm2 = vcmask 0   ;;  %s124_s15 = int_to_ptr.hbm [resolvable:$true] %s123_s15 }
   0x4   :  { %84 = vperm.xlu0 %150, %v73_v0   ;;  %v82_v4 = vand.u32 127, %v81_v3  ;;  %s121_s0 = sshll.u32 %s179_s1, 4  ;;  %s122_s0 = int_to_ptr.vmem [resolvable:$true] %s121_s0 }
   0xa   :  { %v94_v9 = vld [vmem:[#allocation2] sm:$0xff] }
  0x76   :  { %v85_v5 = vpop.permute.xlu0 %84 }
  0x77   :  { %vm86_vm1 = vcmp.eq.s32.totalorder %v82_v4, %v85_v5 }
  0x78   :  { %v144_v7 = vsel %vm86_vm1, 1.0, %v178_v2 }
  0x79   :  { %v89_v8 = vsub.f32 %v72_v6, %v144_v7 }
  0x7b   :  { %v90_v10 = vmul.f32 %v89_v8, %v89_v8 }
  0x7d   :  { %v96_v11 = vadd.f32 %v94_v9, %v90_v10 }
  0x7f   :  { %98 = vst.msk [vmem:[#allocation2] sm:$0xff] %vm70_vm0, %v96_v11 }
  0x86   :  { %v102_v12 = vld [vmem:[#allocation2] sm:$0xff] }
  0x87   :  { %v103_v13 = vsel %vm70_vm0, %v102_v12, 0.0 }
  0x88   :  { %104 = vadd.xlane.f32.xlu0 %v103_v13 }
  0xfb   :  { %v105_v14 = vpop.xlane.xlu0 %104 }
  0xfc   :  { %v106_v15 = vrot.slane %v105_v14, 4 }
  0xfe   :  { %v107_v16 = vadd.f32 %v106_v15, %v105_v14 }
 0x100   :  { %v108_v17 = vrot.slane %v107_v16, 2 }
 0x102   :  { %v109_v18 = vadd.f32 %v108_v17, %v107_v16 }
 0x104   :  { %v110_v19 = vrot.slane %v109_v18, 1 }
 0x106   :  { %v111_v20 = vadd.f32 %v110_v19, %v109_v18 }
 0x108   :  { %145 = vpush %v111_v20 }
 0x139   :  { %s146_s16 = spop %145 }
 0x13a   :  { %v113_v21 = vstv %s146_s16 }
 0x13b   :  { %115 = vst.msk [vmem:[#allocation3] sm:$0x1] %vm114_vm2, %v113_v21 }
 0x13c   :  { %126 = dma.vmem_to_hbm [thread:$0]  %s122_s0, 16, %s124_s15, [#allocation4]  }
 0x13d   :  { %175 = dma.done.wait [#allocation4], 16  }
 0x13e   :  { %176 = vsyncadd [#allocation4], 4294967280 }
 0x13f   :  { %131 = vsyncpa [#allocation4], 1 }

</bundles_post_ra>
